<compile_context>
chip_gen: v7x
topology: tpu7x:2x2x1
jax: 0.10.0
libtpu: 0.0.40
codegen_flags: <defaults>
</compile_context>

<pallas_src>
import math

import jax
import jax.numpy as jnp
from jax.experimental import pallas as pl
from jax.experimental.pallas import tpu as pltpu


LANE = 128               # vreg lane width: batch lives on this axis in-kernel
TILE_B_MAX = 4096        # large batch tile to amortize ~0.35 us per grid step
MIN_KERNEL_BATCH = 512   # below this, fused XLA beats pallas_call launch cost


def _round_up(x, m):
    return ((x + m - 1) // m) * m


def _cdiv(a, b):
    return (a + b - 1) // b


def _actor_kernel(const_ref, obs_ref, act_ref,
                  w1_ref, b1_ref, w2_ref, b2_ref, w3_ref, b3_ref,
                  inv_std_ref, mu_ref, logp_ref):
    """Transposed forward: every activation is (features, tile_b)."""
    x = obs_ref[...]                                          # (obs_dim, tile_b)

    # mu_net: Linear->tanh, Linear->tanh, Linear (f32 everywhere, no casts —
    # the MXU is a tiny fraction utilized at these widths, so reduced precision
    # would only add VPU work on the real bottleneck path).
    h1 = jnp.tanh(jnp.dot(w1_ref[...], x,
                          preferred_element_type=jnp.float32) + b1_ref[...])
    h2 = jnp.tanh(jnp.dot(w2_ref[...], h1,
                          preferred_element_type=jnp.float32) + b2_ref[...])
    mu = jnp.dot(w3_ref[...], h2,
                 preferred_element_type=jnp.float32) + b3_ref[...]
    mu_ref[...] = mu                                          # (act_dim, tile_b)

    # Diagonal-Gaussian log-prob of `act` under N(mu, diag(exp(log_std)^2)).
    # exp(-log_std) and the additive constant are hoisted into the wrapper.
    z = (act_ref[...] - mu) * inv_std_ref[...]                # (act_dim, tile_b)
    logp_ref[...] = const_ref[0, 0] - 0.5 * jnp.sum(z * z, axis=0,
                                                    keepdims=True)


def _reference(obs, act, params):
    """Plain-XLA forward (also the small-batch dispatch target)."""
    w1, b1, w2, b2, w3, b3, log_std = params
    h1 = jnp.tanh(obs @ w1 + b1)
    h2 = jnp.tanh(h1 @ w2 + b2)
    mu = h2 @ w3 + b3
    act_dim = mu.shape[-1]
    z = (act - mu) * jnp.exp(-log_std)
    logp = (-0.5 * jnp.sum(z * z, axis=-1)
            - jnp.sum(log_std)
            - 0.5 * act_dim * math.log(2.0 * math.pi))
    return mu, logp


def mlp_gaussian_actor_forward(obs, act, params, *, use_kernel=None):
    """Returns (mu, log_std, logp_a) — the tensors defining `pi` plus logp_a."""
    w1, b1, w2, b2, w3, b3, log_std = params
    B, obs_dim = obs.shape
    h1_dim = w1.shape[1]
    h2_dim = w2.shape[1]
    act_dim = w3.shape[1]

    if use_kernel is None:
        use_kernel = B >= MIN_KERNEL_BATCH
    if not use_kernel:
        mu, logp_a = _reference(obs, act, params)
        return mu, log_std[0], logp_a

    # Hoisted per-call scalars (computed once, not per grid step).
    inv_std_t = jnp.exp(-log_std).astype(jnp.float32).reshape(act_dim, 1)
    const = (jnp.asarray(-0.5 * act_dim * math.log(2.0 * math.pi), jnp.float32)
             - jnp.sum(log_std))
    const = const.reshape(1, 1).astype(jnp.float32)           # (1, 1) SMEM

    # Transposed (out, in) weights and (out, 1) biases so the kernel computes
    # h^T = W^T @ x^T with the batch on the 128-lane axis.
    w1_t, w2_t, w3_t = w1.T, w2.T, w3.T
    b1_t = b1.reshape(h1_dim, 1)
    b2_t = b2.reshape(h2_dim, 1)
    b3_t = b3.reshape(act_dim, 1)

    # Batch tiling on the lane axis (multiples of 128).  Use >=2 (even) grid
    # steps when the batch allows so both v7x TensorCores get work.
    b_min = _round_up(B, LANE)
    n_steps = max(1, _cdiv(b_min, TILE_B_MAX))
    if b_min >= 2 * LANE:
        n_steps = max(2, n_steps)
        if n_steps % 2:
            n_steps += 1
    tile_b = _round_up(_cdiv(b_min, n_steps), LANE)
    b_padded = _round_up(b_min, tile_b)
    grid = (b_padded // tile_b,)

    obs_t = jnp.pad(obs.T, ((0, 0), (0, b_padded - B)))       # (obs_dim, Bp)
    act_t = jnp.pad(act.T, ((0, 0), (0, b_padded - B)))       # (act_dim, Bp)

    def lane_spec(feat):
        # Batch-tiled input: full feature rows, tile_b lane columns per step.
        return pl.BlockSpec((feat, tile_b), lambda i: (0, i))

    def resident_spec(shape):
        # Whole (tiny) array, block index fixed at (0, 0) -> loaded once,
        # VMEM-resident across all grid iterations.
        return pl.BlockSpec(shape, lambda i: (0, 0))

    mu_t, logp_t = pl.pallas_call(
        _actor_kernel,
        out_shape=(jax.ShapeDtypeStruct((act_dim, b_padded), jnp.float32),
                   jax.ShapeDtypeStruct((1, b_padded), jnp.float32)),
        grid=grid,
        in_specs=[
            pl.BlockSpec((1, 1), lambda i: (0, 0),
                         memory_space=pltpu.MemorySpace.SMEM),   # const
            lane_spec(obs_dim),                                  # obs^T
            lane_spec(act_dim),                                  # act^T
            resident_spec((h1_dim, obs_dim)),                    # W1^T
            resident_spec((h1_dim, 1)),                          # b1
            resident_spec((h2_dim, h1_dim)),                     # W2^T
            resident_spec((h2_dim, 1)),                          # b2
            resident_spec((act_dim, h2_dim)),                    # W3^T
            resident_spec((act_dim, 1)),                         # b3
            resident_spec((act_dim, 1)),                         # exp(-log_std)
        ],
        out_specs=(pl.BlockSpec((act_dim, tile_b), lambda i: (0, i)),
                   pl.BlockSpec((1, tile_b), lambda i: (0, i))),
        compiler_params=pltpu.CompilerParams(
            # Batch axis is embarrassingly parallel -> shard across the two
            # TensorCores on v7x; no-op on single-TC v5e/v6e.
            dimension_semantics=("parallel",),
        ),
    )(const, obs_t, act_t, w1_t, b1_t, w2_t, b2_t, w3_t, b3_t, inv_std_t)

    mu = mu_t[:, :B].T                 # back to the module's (B, act_dim) view
    logp_a = logp_t[0, :B]
    return mu, log_std[0], logp_a


def init_params(key, obs_dim, hidden_sizes, act_dim):
    sizes = [obs_dim] + list(hidden_sizes) + [act_dim]
    params = []
    for i in range(len(sizes) - 1):
        key, kw, kb = jax.random.split(key, 3)
        fan_in = sizes[i]
        bound = 1.0 / math.sqrt(fan_in)     # PyTorch nn.Linear default init range
        w = jax.random.uniform(kw, (sizes[i], sizes[i + 1]), jnp.float32, -bound, bound)
        b = jax.random.uniform(kb, (1, sizes[i + 1]), jnp.float32, -bound, bound)
        params += [w, b]
    log_std = jnp.full((1, act_dim), -0.5, dtype=jnp.float32)   # Parameter.fill_(-0.5)
    return tuple(params) + (log_std,)


# TODO(synk): pi.sample() (drawing from the MultivariateNormal) is not
# implemented in-kernel; the kernel returns mu / log_std / logp_a, which fully
# define the distribution and the quantities the module's forward() exposes.

if __name__ == "__main__":
    obs_dim, act_dim = 16, 8
    hidden_sizes = (32, 32)

    key = jax.random.PRNGKey(0)
    kp, ko, ka = jax.random.split(key, 3)
    params = init_params(kp, obs_dim, hidden_sizes, act_dim)

    # Small-batch check: forces the Pallas path (default dispatch would route
    # B < 512 to plain XLA, which wins at rollout-sized batches).
    B = 8
    obs = jax.random.normal(ko, (B, obs_dim), jnp.float32)
    act = jax.random.normal(ka, (B, act_dim), jnp.float32)
    mu_ref, logp_ref = _reference(obs, act, params)
    mu, log_std, logp_a = mlp_gaussian_actor_forward(obs, act, params,
                                                     use_kernel=True)
    jax.block_until_ready((mu, log_std, logp_a))
    assert mu.shape == (B, act_dim) and logp_a.shape == (B,)
    assert log_std.shape == (act_dim,)
    assert jnp.allclose(mu, mu_ref, atol=1e-4, rtol=1e-5)
    assert jnp.allclose(logp_a, logp_ref, atol=1e-4, rtol=1e-5)

    # Multi-tile check: exercises batch padding, a 2-step "parallel" grid (both
    # v7x TensorCores) and the lane-dense multi-block writeback.
    B2 = 640
    ko2, ka2 = jax.random.split(jax.random.PRNGKey(1))
    obs2 = jax.random.normal(ko2, (B2, obs_dim), jnp.float32)
    act2 = jax.random.normal(ka2, (B2, act_dim), jnp.float32)
    mu2_ref, logp2_ref = _reference(obs2, act2, params)
    mu2, _, logp2 = mlp_gaussian_actor_forward(obs2, act2, params)
    jax.block_until_ready((mu2, logp2))
    assert jnp.allclose(mu2, mu2_ref, atol=1e-4, rtol=1e-5)
    assert jnp.allclose(logp2, logp2_ref, atol=1e-4, rtol=1e-5)

    print("KERNEL_OK")
</pallas_src>

<mosaic_0001>
module attributes {stable_mosaic.version = 11 : i64} {
  func.func @_actor_kernel(%arg0: i32, %arg1: memref<1x1xf32, #tpu.memory_space<smem>>, %arg2: memref<16x128xf32, #tpu.memory_space<vmem>>, %arg3: memref<8x128xf32, #tpu.memory_space<vmem>>, %arg4: memref<32x16xf32, #tpu.memory_space<vmem>>, %arg5: memref<32x1xf32, #tpu.memory_space<vmem>>, %arg6: memref<32x32xf32, #tpu.memory_space<vmem>>, %arg7: memref<32x1xf32, #tpu.memory_space<vmem>>, %arg8: memref<8x32xf32, #tpu.memory_space<vmem>>, %arg9: memref<8x1xf32, #tpu.memory_space<vmem>>, %arg10: memref<8x1xf32, #tpu.memory_space<vmem>>, %arg11: memref<8x128xf32, #tpu.memory_space<vmem>>, %arg12: memref<1x128xf32, #tpu.memory_space<vmem>>) attributes {dimension_semantics = [#tpu.dimension_semantics<parallel>], iteration_bounds = array<i64: 1>, scalar_prefetch = 0 : i64, scratch_operands = 0 : i64, tpu.core_type = #tpu.core_type<tc>, window_params = [{transform_indices = @transform_0, window_bounds = array<i64: 1, 1>}, {transform_indices = @transform_1, window_bounds = array<i64: 16, 128>}, {transform_indices = @transform_2, window_bounds = array<i64: 8, 128>}, {pipeline_mode = #tpu.pipeline_mode<synchronous>, transform_indices = @transform_3, window_bounds = array<i64: 32, 16>}, {pipeline_mode = #tpu.pipeline_mode<synchronous>, transform_indices = @transform_4, window_bounds = array<i64: 32, 1>}, {pipeline_mode = #tpu.pipeline_mode<synchronous>, transform_indices = @transform_5, window_bounds = array<i64: 32, 32>}, {pipeline_mode = #tpu.pipeline_mode<synchronous>, transform_indices = @transform_6, window_bounds = array<i64: 32, 1>}, {pipeline_mode = #tpu.pipeline_mode<synchronous>, transform_indices = @transform_7, window_bounds = array<i64: 8, 32>}, {pipeline_mode = #tpu.pipeline_mode<synchronous>, transform_indices = @transform_8, window_bounds = array<i64: 8, 1>}, {pipeline_mode = #tpu.pipeline_mode<synchronous>, transform_indices = @transform_9, window_bounds = array<i64: 8, 1>}, {transform_indices = @transform_10, window_bounds = array<i64: 8, 128>}, {transform_indices = @transform_11, window_bounds = array<i64: 1, 128>}]} {
    %c0 = arith.constant 0 : index
    %c0_0 = arith.constant 0 : index
    %0 = vector.load %arg2[%c0, %c0_0] : memref<16x128xf32, #tpu.memory_space<vmem>>, vector<16x128xf32>
    %c0_1 = arith.constant 0 : index
    %c0_2 = arith.constant 0 : index
    %1 = vector.load %arg4[%c0_1, %c0_2] : memref<32x16xf32, #tpu.memory_space<vmem>>, vector<32x16xf32>
    %cst = arith.constant dense<0.000000e+00> : vector<32x128xf32>
    %2 = tpu.matmul %1, %0, %cst {dimension_numbers = #tpu.dot_dimension_numbers<[1], [0], [0], [1], [0, 0, 1, 1], [], []>} : vector<32x16xf32>, vector<16x128xf32>, vector<32x128xf32> -> vector<32x128xf32>
    %c0_3 = arith.constant 0 : index
    %c0_4 = arith.constant 0 : index
    %3 = vector.load %arg5[%c0_3, %c0_4] : memref<32x1xf32, #tpu.memory_space<vmem>>, vector<32x1xf32>
    %4 = vector.broadcast %3 : vector<32x1xf32> to vector<32x128xf32>
    %5 = arith.addf %2, %4 : vector<32x128xf32>
    %6 = math.tanh %5 : vector<32x128xf32>
    %c0_5 = arith.constant 0 : index
    %c0_6 = arith.constant 0 : index
    %7 = vector.load %arg6[%c0_5, %c0_6] : memref<32x32xf32, #tpu.memory_space<vmem>>, vector<32x32xf32>
    %cst_7 = arith.constant dense<0.000000e+00> : vector<32x128xf32>
    %8 = tpu.matmul %7, %6, %cst_7 {dimension_numbers = #tpu.dot_dimension_numbers<[1], [0], [0], [1], [0, 0, 1, 1], [], []>} : vector<32x32xf32>, vector<32x128xf32>, vector<32x128xf32> -> vector<32x128xf32>
    %c0_8 = arith.constant 0 : index
    %c0_9 = arith.constant 0 : index
    %9 = vector.load %arg7[%c0_8, %c0_9] : memref<32x1xf32, #tpu.memory_space<vmem>>, vector<32x1xf32>
    %10 = vector.broadcast %9 : vector<32x1xf32> to vector<32x128xf32>
    %11 = arith.addf %8, %10 : vector<32x128xf32>
    %12 = math.tanh %11 : vector<32x128xf32>
    %c0_10 = arith.constant 0 : index
    %c0_11 = arith.constant 0 : index
    %13 = vector.load %arg8[%c0_10, %c0_11] : memref<8x32xf32, #tpu.memory_space<vmem>>, vector<8x32xf32>
    %cst_12 = arith.constant dense<0.000000e+00> : vector<8x128xf32>
    %14 = tpu.matmul %13, %12, %cst_12 {dimension_numbers = #tpu.dot_dimension_numbers<[1], [0], [0], [1], [0, 0, 1, 1], [], []>} : vector<8x32xf32>, vector<32x128xf32>, vector<8x128xf32> -> vector<8x128xf32>
    %c0_13 = arith.constant 0 : index
    %c0_14 = arith.constant 0 : index
    %15 = vector.load %arg9[%c0_13, %c0_14] : memref<8x1xf32, #tpu.memory_space<vmem>>, vector<8x1xf32>
    %16 = vector.broadcast %15 : vector<8x1xf32> to vector<8x128xf32>
    %17 = arith.addf %14, %16 : vector<8x128xf32>
    %c0_15 = arith.constant 0 : index
    %c0_16 = arith.constant 0 : index
    %18 = vector.load %arg11[%c0_15, %c0_16] : memref<8x128xf32, #tpu.memory_space<vmem>>, vector<8x128xf32>
    tpu.vector_store %arg11[%c0_15, %c0_16], %17 {strides = array<i32>} : memref<8x128xf32, #tpu.memory_space<vmem>>, vector<8x128xf32>,
    %c0_17 = arith.constant 0 : index
    %c0_18 = arith.constant 0 : index
    %19 = vector.load %arg3[%c0_17, %c0_18] : memref<8x128xf32, #tpu.memory_space<vmem>>, vector<8x128xf32>
    %20 = arith.subf %19, %17 : vector<8x128xf32>
    %c0_19 = arith.constant 0 : index
    %c0_20 = arith.constant 0 : index
    %21 = vector.load %arg10[%c0_19, %c0_20] : memref<8x1xf32, #tpu.memory_space<vmem>>, vector<8x1xf32>
    %22 = vector.broadcast %21 : vector<8x1xf32> to vector<8x128xf32>
    %23 = arith.mulf %20, %22 : vector<8x128xf32>
    %c0_21 = arith.constant 0 : index
    %c0_22 = arith.constant 0 : index
    %24 = memref.load %arg1[%c0_21, %c0_22] : memref<1x1xf32, #tpu.memory_space<smem>>
    %25 = arith.mulf %23, %23 : vector<8x128xf32>
    %cst_23 = arith.constant dense<0.000000e+00> : vector<128xf32>
    %26 = vector.multi_reduction <add>, %25, %cst_23 [0] : vector<8x128xf32> to vector<128xf32>
    %27 = vector.shape_cast %26 : vector<128xf32> to vector<1x128xf32>
    %cst_24 = arith.constant 5.000000e-01 : f32
    %28 = vector.broadcast %cst_24 : f32 to vector<1x128xf32>
    %29 = arith.mulf %28, %27 : vector<1x128xf32>
    %30 = vector.broadcast %24 : f32 to vector<1x128xf32>
    %31 = arith.subf %30, %29 : vector<1x128xf32>
    %c0_25 = arith.constant 0 : index
    %c0_26 = arith.constant 0 : index
    %32 = vector.load %arg12[%c0_25, %c0_26] : memref<1x128xf32, #tpu.memory_space<vmem>>, vector<1x128xf32>
    tpu.vector_store %arg12[%c0_25, %c0_26], %31 {strides = array<i32>} : memref<1x128xf32, #tpu.memory_space<vmem>>, vector<1x128xf32>,
    return
  }
  func.func @transform_0(%arg0: i32) -> (i32, i32) {
    %c0_i32 = arith.constant 0 : i32
    %c0_i32_0 = arith.constant 0 : i32
    %c0_i32_1 = arith.constant 0 : i32
    return %c0_i32, %c0_i32_0 : i32, i32
  }
  func.func @transform_1(%arg0: i32) -> (i32, i32) {
    %c0_i32 = arith.constant 0 : i32
    %c0_i32_0 = arith.constant 0 : i32
    return %c0_i32, %arg0 : i32, i32
  }
  func.func @transform_2(%arg0: i32) -> (i32, i32) {
    %c0_i32 = arith.constant 0 : i32
    %c0_i32_0 = arith.constant 0 : i32
    return %c0_i32, %arg0 : i32, i32
  }
  func.func @transform_3(%arg0: i32) -> (i32, i32) {
    %c0_i32 = arith.constant 0 : i32
    %c0_i32_0 = arith.constant 0 : i32
    %c0_i32_1 = arith.constant 0 : i32
    return %c0_i32, %c0_i32_0 : i32, i32
  }
  func.func @transform_4(%arg0: i32) -> (i32, i32) {
    %c0_i32 = arith.constant 0 : i32
    %c0_i32_0 = arith.constant 0 : i32
    %c0_i32_1 = arith.constant 0 : i32
    return %c0_i32, %c0_i32_0 : i32, i32
  }
  func.func @transform_5(%arg0: i32) -> (i32, i32) {
    %c0_i32 = arith.constant 0 : i32
    %c0_i32_0 = arith.constant 0 : i32
    %c0_i32_1 = arith.constant 0 : i32
    return %c0_i32, %c0_i32_0 : i32, i32
  }
  func.func @transform_6(%arg0: i32) -> (i32, i32) {
    %c0_i32 = arith.constant 0 : i32
    %c0_i32_0 = arith.constant 0 : i32
    %c0_i32_1 = arith.constant 0 : i32
    return %c0_i32, %c0_i32_0 : i32, i32
  }
  func.func @transform_7(%arg0: i32) -> (i32, i32) {
    %c0_i32 = arith.constant 0 : i32
    %c0_i32_0 = arith.constant 0 : i32
    %c0_i32_1 = arith.constant 0 : i32
    return %c0_i32, %c0_i32_0 : i32, i32
  }
  func.func @transform_8(%arg0: i32) -> (i32, i32) {
    %c0_i32 = arith.constant 0 : i32
    %c0_i32_0 = arith.constant 0 : i32
    %c0_i32_1 = arith.constant 0 : i32
    return %c0_i32, %c0_i32_0 : i32, i32
  }
  func.func @transform_9(%arg0: i32) -> (i32, i32) {
    %c0_i32 = arith.constant 0 : i32
    %c0_i32_0 = arith.constant 0 : i32
    %c0_i32_1 = arith.constant 0 : i32
    return %c0_i32, %c0_i32_0 : i32, i32
  }
  func.func @transform_10(%arg0: i32) -> (i32, i32) {
    %c0_i32 = arith.constant 0 : i32
    %c0_i32_0 = arith.constant 0 : i32
    return %c0_i32, %arg0 : i32, i32
  }
  func.func @transform_11(%arg0: i32) -> (i32, i32) {
    %c0_i32 = arith.constant 0 : i32
    %c0_i32_0 = arith.constant 0 : i32
    return %c0_i32, %arg0 : i32, i32
  }
}

</mosaic_0001>

<bundles_post_ra>
// kernel: tpu_custom_call.1
= control target key start
LH: loop header
LB: loop body
LE: loop exit
PB: predicated region body
PF: predicated region fallthrough
CT: control target
= control target key end

     0   :  { %18 = vsyncpa [#allocation4], 0  ;;  %vm70_vm0 = vcmask 130048   ;;  %v585_v4 = vmov 0   ;;  %s753_s0 = inlined_call_operand.<no memory space> [shape: f32[1,1], index: 0, kind: input, shape index: {}]   ;;  %s754_s1 = inlined_call_operand.vmem [shape: f32[16,128], index: 1, kind: input, shape index: {}]   ;;  %s755_s2 = inlined_call_operand.vmem [shape: f32[8,128], index: 2, kind: input, shape index: {}]   ;;  %s756_s3 = inlined_call_operand.vmem [shape: f32[32,16], index: 3, kind: input, shape index: {}]   ;;  %s757_s4 = inlined_call_operand.vmem [shape: f32[32,1], index: 4, kind: input, shape index: {}]   ;;  %s758_s5 = inlined_call_operand.vmem [shape: f32[32,32], index: 5, kind: input, shape index: {}]   ;;  %s759_s6 = inlined_call_operand.vmem [shape: f32[32,1], index: 6, kind: input, shape index: {}]   ;;  %s760_s7 = inlined_call_operand.vmem [shape: f32[8,32], index: 7, kind: input, shape index: {}]   ;;  %s761_s8 = inlined_call_operand.vmem [shape: f32[8,1], index: 8, kind: input, shape index: {}]   ;;  %s762_s9 = inlined_call_operand.vmem [shape: f32[8,1], index: 9, kind: input, shape index: {}]   ;;  %s763_s10 = inlined_call_operand.hbm [shape: f32[8,128], index: 10, kind: output, shape index: {0}]   ;;  %s764_s11 = inlined_call_operand.hbm [shape: f32[1,128], index: 11, kind: output, shape index: {1}]  }
   0x1   :  { %v40_v0 = vld [vmem:[%s754_s1] sm:$0xff]  ;;  %v41_v1 = vld [vmem:[%s754_s1 + $0x8] sm:$0xff]  ;;  %519 = vset.pattern.permute.xlu0 %v585_v4  ;;  %520 = vset.pattern.permute.xlu1 %v585_v4  ;;  %v48_v6 = vld [vmem:[%s757_s4 + $0x10] sm:$0xff] }
   0x2   :  { %v42_v2 = vld [vmem:[%s756_s3] sm:$0xff]  ;;  %v495_v3 = vpack.c.bf16 %v41_v1, %v40_v0  ;;  %v43_v7 = vld [vmem:[%s756_s3 + $0x8] sm:$0xff]  ;;  %62 = vperm.xlu1 %520, %v48_v6   ;;  %v44_v9 = vld [vmem:[%s756_s3 + $0x10] sm:$0xff] }
   0x3   :  { %464 = vmatprep.mubr.msk.f32.mxu0 %vm70_vm0, %v42_v2  ;;  %v46_v5 = vld [vmem:[%s757_s4] sm:$0xff]  ;;  %v47_v8 = vld [vmem:[%s757_s4 + $0x8] sm:$0xff]  ;;  %v49_v10 = vld [vmem:[%s757_s4 + $0x18] sm:$0xff] }
   0x4   :  { %496 = vmatprep.subr.bf16.mxu0 %v495_v3  ;;  %52 = vperm.xlu0 %519, %v46_v5  }
   0x5   :  { %498 = vmatpush3.bf16.msra.mxu0 %v495_v3 }
   0x6   :  { %19 = vsyncpa [#allocation6], 0  ;;  %v45_v11 = vld [vmem:[%s756_s3 + $0x18] sm:$0xff]  ;;  %67 = vperm.xlu1 %520, %v49_v10   ;;  %v176_v12 = vld [vmem:[%s759_s6] sm:$0xff]  ;;  %vm200_vm1 = vcmask 261120   ;;  %v586_v40 = vmov 0.0|0.0  }
   0x7   :  { %v177_v13 = vld [vmem:[%s759_s6 + $0x8] sm:$0xff]  ;;  %v178_v14 = vld [vmem:[%s759_s6 + $0x10] sm:$0xff]  ;;  %v179_v15 = vld [vmem:[%s759_s6 + $0x18] sm:$0xff]  ;;  %507 = vmatprep.subr.bf16.mxu0 %v586_v40  ;;  %vm587_vm2 = vmmov 0   ;;  %v588_v41 = vmov 0.0   ;;  %s589_s13 = smov [#allocation3]  }
   0x8   :  { %465 = vmatmul.mubr.msk.f32.vlgmr.msra.gmra.mrb[0].mxu0 %vm70_vm0, %v43_v7  ;;  %57 = vperm.xlu0 %519, %v47_v8   ;;  %v303_v16 = vld [vmem:[%s761_s8] sm:$0xff]  ;;  %v173_v37 = vld [vmem:[%s758_s5 + $0x8] sm:$0xff]  ;;  %v174_v38 = vld [vmem:[%s758_s5 + $0x10] sm:$0xff]  ;;  %s410_s14 = sshll.u32 %s589_s13, 4  ;;  %s411_s14 = int_to_ptr.vmem [resolvable:$true] %s410_s14 }
   0x9   :  { %467 = vmatprep.mubr.msk.f32.mxu0 %vm70_vm0, %v44_v9  ;;  %v385_v17 = vld [vmem:[%s762_s9] sm:$0xff]  ;;  %v175_v39 = vld [vmem:[%s758_s5 + $0x18] sm:$0xff]  ;;  %s537_s17 = scalar_lea.vmem %s411_s14, 128  ;;  %p542_p1 = scmp.lt.s32.totalorder %s411_s14, %s411_s14 }
   0xa   :  { %187 = vperm.xlu1 %520, %v177_v13   ;;  %v172_v18 = vld [vmem:[%s758_s5] sm:$0xff]  ;;  %p538_p0 = scmp.ne.s32.totalorder %s411_s14, %s537_s17  ;;  %p543_p2 = scmp.lt.s32.totalorder %s537_s17, %s537_s17 }
   0xb   :  { %478 = vmatprep.mubr.msk.f32.mxu1 %vm200_vm1, %v172_v18  ;;  %v302_v60 = vld [vmem:[%s760_s7] sm:$0xff] }
   0xc   :  { %468 = vmatmul.mubr.msk.f32.gmra.mrb[2].mxu0 %vm70_vm0, %v45_v11  ;;  %182 = vperm.xlu0 %519, %v176_v12   ;;  %v383_v63 = vld [vmem:[%s755_s2] sm:$0xff]  ;;  %p544_p3 = por %p543_p2, %p542_p1 }
   0xd   :  { %492 = vmatprep.mubr.msk.f32.mxu0 %vm587_vm2, %v588_v41 }
   0xe   :  { %197 = vperm.xlu1 %520, %v179_v15   ;;  %p545_p4 = pnand %p544_p3, %p538_p0 }
  0x10   :  { %192 = vperm.xlu0 %519, %v178_v14  }
  0x12   :  { %388 = vperm.xlu1 %520, %v385_v17  }
  0x14   :  { %306 = vperm.xlu0 %519, %v303_v16  }
  0x81   :  { %v63_v20 = vpop.permute.xlu1 %62 }
  0x83   :  { %v53_v19 = vpop.permute.xlu0 %52 }
  0x85   :  { %v68_v26 = vpop.permute.xlu1 %67 }
  0x87   :  { %v58_v21 = vpop.permute.xlu0 %57 }
  0x89   :  { %v188_v42 = vpop.permute.xlu1 %187 }
  0x8b   :  { %v183_v43 = vpop.permute.xlu0 %182 }
  0x8d   :  { %v198_v48 = vpop.permute.xlu1 %197 }
  0x8f   :  { %v193_v50 = vpop.permute.xlu0 %192 }
  0x91   :  { %v389_v3 = vpop.permute.xlu1 %388 }
  0x93   :  { %v307_v61 = vpop.permute.xlu0 %306 }
  0xdb   :  { %v466_v22 = vpop.f32.mrb[0].mxu0 }
  0xdc   :  { %v155_v23 = vadd.f32 %v466_v22, %v58_v21  ;;  %v149_v24 = vpop.f32.mrb[1].mxu0 }
  0xdd   :  { %v150_v25 = vadd.f32 %v149_v24, %v53_v19 }
  0xde   :  { %521 = vtanh.f32 %v155_v23 }
  0xdf   :  { %523 = vtanh.f32 %v150_v25  ;;  %v469_v27 = vpop.f32.mrb[2].mxu0 }
  0xe0   :  { %v165_v28 = vadd.f32 %v469_v27, %v68_v26  ;;  %v159_v29 = vpop.f32.mrb[3].mxu0 }
  0xe1   :  { %v160_v30 = vadd.f32 %v159_v29, %v63_v20 }
  0xe2   :  { %525 = vtanh.f32 %v165_v28 }
  0xe3   :  { %527 = vtanh.f32 %v160_v30 }
  0xe8   :  { %v522_v31 = vpop.eup %521 }
  0xe9   :  { %v524_v32 = vpop.eup %523 }
  0xea   :  { %v499_v33 = vpack.c.bf16 %v522_v31, %v524_v32 }
  0xec   :  { %v526_v34 = vpop.eup %525  ;;  %500 = vmatprep.subr.bf16.mxu1 %v499_v33 }
  0xed   :  { %v528_v35 = vpop.eup %527  ;;  %502 = vmatpush3.bf16.msra.mxu1 %v499_v33 }
  0xee   :  { %v503_v36 = vpack.c.bf16 %v526_v34, %v528_v35 }
  0xf0   :  { %504 = vmatprep.subr.bf16.mxu1 %v503_v36 }
  0xf1   :  { %506 = vmatpush3.bf16.msra.mxu1 %v503_v36 }
  0xf4   :  { %479 = vmatmul.mubr.msk.f32.vlgmr.msra.gmra.mrb[0].mxu1 %vm200_vm1, %v173_v37 }
  0xf5   :  { %481 = vmatprep.mubr.msk.f32.mxu1 %vm200_vm1, %v174_v38 }
  0xf8   :  { %482 = vmatmul.mubr.msk.f32.gmra.mrb[2].mxu1 %vm200_vm1, %v175_v39 }
 0x1c7   :  { %v480_v44 = vpop.f32.mrb[0].mxu1 }
 0x1c8   :  { %v285_v45 = vadd.f32 %v480_v44, %v188_v42  ;;  %v279_v46 = vpop.f32.mrb[1].mxu1 }
 0x1c9   :  { %v280_v47 = vadd.f32 %v279_v46, %v183_v43 }
 0x1ca   :  { %529 = vtanh.f32 %v285_v45 }
 0x1cb   :  { %531 = vtanh.f32 %v280_v47  ;;  %v483_v49 = vpop.f32.mrb[2].mxu1 }
 0x1cc   :  { %v295_v51 = vadd.f32 %v483_v49, %v198_v48  ;;  %v289_v52 = vpop.f32.mrb[3].mxu1 }
 0x1cd   :  { %v290_v53 = vadd.f32 %v289_v52, %v193_v50 }
 0x1ce   :  { %533 = vtanh.f32 %v295_v51 }
 0x1cf   :  { %535 = vtanh.f32 %v290_v53 }
 0x1d4   :  { %v530_v54 = vpop.eup %529 }
 0x1d5   :  { %v532_v55 = vpop.eup %531 }
 0x1d6   :  { %v508_v56 = vpack.c.bf16 %v530_v54, %v532_v55 }
 0x1d8   :  { %v534_v57 = vpop.eup %533  ;;  %509 = vmatpush3.bf16.msra.mxu0 %v508_v56 }
 0x1d9   :  { %v536_v58 = vpop.eup %535  ;;  %510 = vmatprep.subr.bf16.mxu0 %v586_v40 }
 0x1da   :  { %v511_v59 = vpack.c.bf16 %v534_v57, %v536_v58 }
 0x1dc   :  { %512 = vmatpush3.bf16.msra.mxu0 %v511_v59 }
 0x1df   :  { %493 = vmatmul.mubr.msk.f32.vlgmr.msra.gmra.mrb[4].mxu0 %vm200_vm1, %v302_v60 }
 0x2b2   :  { %v378_v62 = vpop.f32.mrb[4].mxu0 }
 0x2b3   :  { %v379_v0 = vadd.f32 %v378_v62, %v307_v61  ;;  %v494_v1 = vpop.f32.mrb[5].mxu0 }
 0x2b5   :  { %v384_v2 = vsub.f32 %v383_v63, %v379_v0  ;;  %382 = vst [vmem:[#allocation3] sm:$0xff] %v379_v0 }
 0x2b6   :  { %548 = shalt.err (!%p545_p4)
}
 0x2b7   :  { %s549_s19 = scalar_lea.hbm %s763_s10, 128 }
 0x2b8   :  { %p550_p5 = scmp.ne.s32.totalorder %s763_s10, %s549_s19  ;;  %p553_p6 = scmp.lt.u32.totalorder %s549_s19, %s763_s10 }
 0x2ba   :  { %p555_p7 = pnand %p553_p6, %p550_p5 }
 0x2bc   :  { %558 = shalt.err (!%p555_p7)
}
 0x2bd   :  { %413 = dma.vmem_to_hbm [thread:$0]  %s411_s14, 128, %s763_s10, [#allocation4]   ;;  %v391_v4 = vmul.f32 %v389_v3, %v384_v2  ;;  %v401_v12 = vstv %s753_s0 }
 0x2be   :  { %s590_s25 = smov [#allocation5]  }
 0x2bf   :  { %v393_v5 = vmul.f32 %v391_v4, %v391_v4  ;;  %s420_s26 = sshll.u32 %s590_s25, 4  ;;  %s421_s26 = int_to_ptr.vmem [resolvable:$true] %s420_s26 }
 0x2c0   :  { %s559_s1 = scalar_lea.vmem %s421_s26, 16  ;;  %s563_s10 = scalar_lea.vmem %s421_s26, 32 }
 0x2c1   :  { %v394_v6 = vrot.slane %v393_v5, 4  ;;  %p560_p8 = scmp.ne.s32.totalorder %s421_s26, %s559_s1  ;;  %p564_p9 = scmp.lt.s32.totalorder %s421_s26, %s421_s26 }
 0x2c2   :  { %p565_p10 = scmp.lt.s32.totalorder %s563_s10, %s559_s1 }
 0x2c3   :  { %v395_v7 = vadd.f32 %v394_v6, %v393_v5 }
 0x2c4   :  { %p566_p11 = por %p565_p10, %p564_p9 }
 0x2c5   :  { %v396_v8 = vrot.slane %v395_v7, 2 }
 0x2c6   :  { %p567_p12 = pnand %p566_p11, %p560_p8 }
 0x2c7   :  { %v397_v9 = vadd.f32 %v396_v8, %v395_v7 }
 0x2c9   :  { %v398_v10 = vrot.slane %v397_v9, 1 }
 0x2cb   :  { %v399_v11 = vadd.f32 %v398_v10, %v397_v9 }
 0x2cd   :  { %v400_v13 = vmul.f32 0.5, %v399_v11 }
 0x2cf   :  { %v402_v14 = vsub.f32 %v401_v12, %v400_v13 }
 0x2d1   :  { %403 = vst [vmem:[#allocation5] sm:$0x1] %v402_v14 }
 0x2d2   :  { %570 = shalt.err (!%p567_p12)
}
 0x2d3   :  { %s571_s8 = scalar_lea.hbm %s764_s11, 16 }
 0x2d4   :  { %p572_p13 = scmp.ne.s32.totalorder %s764_s11, %s571_s8  ;;  %p575_p0 = scmp.lt.u32.totalorder %s571_s8, %s764_s11 }
 0x2d6   :  { %p577_p1 = pnand %p575_p0, %p572_p13 }
 0x2d8   :  { %580 = shalt.err (!%p577_p1)
}
 0x2d9   :  { %423 = dma.vmem_to_hbm [thread:$0]  %s421_s26, 16, %s764_s11, [#allocation6]  }
 0x2da   :  { %581 = dma.done.wait [#allocation4], 128  }
 0x2db   :  { %582 = vsyncadd [#allocation4], 4294967168 }
 0x2dc   :  { %583 = dma.done.wait [#allocation6], 16  }
 0x2dd   :  { %584 = vsyncadd [#allocation6], 4294967280 }
 0x2de   :  { %430 = vsyncpa [#allocation4], 1 }
 0x2df   :  { %431 = vsyncpa [#allocation6], 1 }

</bundles_post_ra>
